<compile_context>
chip_gen: v7x
topology: tpu7x:2x2x1
jax: 0.10.0
libtpu: 0.0.40
codegen_flags: <defaults>
</compile_context>

<pallas_src>
import math

import jax
import jax.numpy as jnp
from jax import lax
from jax.experimental import pallas as pl
from jax.experimental.pallas import tpu as pltpu


_INV_SQRT2 = 1.0 / math.sqrt(2.0)


def _gelu_exact_f32(h):
    # exact GELU (nn.GELU() default): 0.5 * h * (1 + erf(h / sqrt(2)))
    return 0.5 * h * (1.0 + lax.erf(h * _INV_SQRT2))


# ----------------------------- kernels ------------------------------------ #

def _mlp_resident_kernel(x_ref, w1_ref, b1_ref, w2_ref, b2_ref, o_ref):
    # Weights fully VMEM-resident (constant index_map); one grid step computes
    # a full (TM, C) output tile.
    # x_ref : (TM, C)  w1_ref: (C, H)  b1_ref: (1, H)  w2_ref: (H, C)  b2_ref: (1, C)
    h = jnp.dot(x_ref[...], w1_ref[...], preferred_element_type=jnp.float32)
    h = h + b1_ref[...].astype(jnp.float32)
    h = _gelu_exact_f32(h)
    out = jnp.dot(h.astype(w2_ref.dtype), w2_ref[...],
                  preferred_element_type=jnp.float32)
    out = out + b2_ref[...].astype(jnp.float32)
    # dropout: inference mode -> identity.
    # TODO(synk): training-mode dropout (pltpu.prng_random_bits mask) not emitted.
    o_ref[...] = out.astype(o_ref.dtype)


def _mlp_streamed_kernel(x_ref, w1_ref, b1_ref, w2_ref, b2_ref, o_ref, acc_ref):
    # Streamed-weights fallback: 2-D grid (M tiles, H tiles); the f32 VMEM
    # accumulator is resident across the H (reduction) axis.
    j = pl.program_id(1)

    @pl.when(j == 0)
    def _():
        # Fold b2 into the accumulator init (saves an epilogue VALU pass).
        acc_ref[...] = jnp.broadcast_to(
            b2_ref[...].astype(jnp.float32), acc_ref.shape)

    h = jnp.dot(x_ref[...], w1_ref[...], preferred_element_type=jnp.float32)
    h = h + b1_ref[...].astype(jnp.float32)
    h = _gelu_exact_f32(h)
    acc_ref[...] += jnp.dot(h.astype(w2_ref.dtype), w2_ref[...],
                            preferred_element_type=jnp.float32)

    @pl.when(j == pl.num_programs(1) - 1)
    def _():
        # dropout: inference mode -> identity.
        o_ref[...] = acc_ref[...].astype(o_ref.dtype)


# ----------------------------- wrapper ------------------------------------ #

def _round_up(x, m):
    return (x + m - 1) // m * m


def _device_vmem_bytes():
    """Physical VMEM of the current TPU (64 MiB v7x, 128 MiB v5e/v6e)."""
    try:
        info = pltpu.get_tpu_info()
        for attr in ("vmem_capacity_bytes", "vmem_bytes", "vmem_size_bytes"):
            v = getattr(info, attr, None)
            if v:
                return int(v)
    except Exception:
        pass
    return 64 * 1024 * 1024  # conservative (v7x)


def _pick_h_tile(H):
    for c in (512, 256, 128):
        if c <= H and H % c == 0:
            return c
    return H  # caller guards the VMEM fit


def mlp_forward(x, w1, b1, w2, b2, *, tm=None, th=None, weights_resident=None):
    """x: [B, T, C]. w1: [C, 4C] ([in, out], transposed vs torch), b1: [1, 4C],
    w2: [4C, C], b2: [1, C]. Returns [B, T, C]."""
    B, T, C = x.shape
    H = w1.shape[1]
    M = B * T
    x2d = x.reshape(M, C)

    x_bytes = jnp.dtype(x.dtype).itemsize
    w_bytes = jnp.dtype(w1.dtype).itemsize

    vmem_cap = _device_vmem_bytes()
    # Leave headroom for compiler temporaries / double-buffering:
    # ~48 MiB on v7x, ~96 MiB on v5e/v6e.
    vmem_ceiling = int(0.75 * vmem_cap)

    # M tile: large enough to amortize per-step overhead and weight re-streaming,
    # multiple of 256 (MXU-friendly on v6e/v7x), while keeping >= 2 tiles for
    # megacore when M is large enough.
    if tm is None:
        if M >= 2048:
            tm = 1024
        elif M >= 1024:
            tm = 512
        elif M >= 512:
            tm = 256
        else:
            tm = _round_up(M, 8)
    n_m = pl.cdiv(M, tm)

    # VMEM estimate for the weights-resident plan (weights counted as
    # double-buffered to be conservative).
    resident_est = (
        2 * (C * H + H * C + H + C) * w_bytes   # w1/w2/b1/b2
        + 2 * tm * C * x_bytes                  # x tiles (double-buffered)
        + 2 * tm * C * x_bytes                  # out tiles
        + tm * H * 4                            # f32 hidden/GELU slab (temp)
        + 2 * tm * C * 4                        # f32 out temp headroom
    )
    if weights_resident is None:
        weights_resident = resident_est <= int(0.9 * vmem_ceiling)

    flops = 4 * M * C * H          # two matmuls
    transcendentals = M * H        # erf

    if weights_resident:
        vmem_limit = int(min(vmem_ceiling,
                             max(int(1.3 * resident_est), 8 * 1024 * 1024)))
        cost = pl.CostEstimate(
            flops=flops,
            transcendentals=transcendentals,
            bytes_accessed=(2 * M * C * x_bytes
                            + (C * H + H * C + H + C) * w_bytes),
        )
        out = pl.pallas_call(
            _mlp_resident_kernel,
            out_shape=jax.ShapeDtypeStruct((M, C), x.dtype),
            grid_spec=pltpu.PrefetchScalarGridSpec(
                num_scalar_prefetch=0,
                grid=(n_m,),
                in_specs=[
                    pl.BlockSpec((tm, C), lambda i: (i, 0)),   # x (streamed)
                    pl.BlockSpec((C, H), lambda i: (0, 0)),    # w1 (resident)
                    pl.BlockSpec((1, H), lambda i: (0, 0)),    # b1 (resident)
                    pl.BlockSpec((H, C), lambda i: (0, 0)),    # w2 (resident)
                    pl.BlockSpec((1, C), lambda i: (0, 0)),    # b2 (resident)
                ],
                out_specs=pl.BlockSpec((tm, C), lambda i: (i, 0)),
            ),
            compiler_params=pltpu.CompilerParams(
                dimension_semantics=("parallel",),
                vmem_limit_bytes=vmem_limit,
            ),
            cost_estimate=cost,
        )(x2d, w1, b1, w2, b2)
    else:
        if th is None:
            th = _pick_h_tile(H)
        assert H % th == 0, "hidden dim must be divisible by the H tile"
        n_h = H // th

        stream_est = (
            2 * tm * C * x_bytes                      # x tiles
            + 2 * tm * C * x_bytes                    # out tiles
            + 2 * (C * th + th * C + th + C) * w_bytes  # weight/bias slices
            + tm * C * 4                              # f32 accumulator
            + 2 * tm * th * 4                         # f32 GELU slab headroom
        )
        assert stream_est <= vmem_ceiling, (
            "streamed tiles exceed VMEM budget; reduce tm/th")
        vmem_limit = int(min(vmem_ceiling,
                             max(int(1.5 * stream_est), 8 * 1024 * 1024)))
        cost = pl.CostEstimate(
            flops=flops,
            transcendentals=transcendentals,
            bytes_accessed=(2 * M * C * x_bytes
                            + n_m * (C * H + H * C + H + C) * w_bytes),
        )
        out = pl.pallas_call(
            _mlp_streamed_kernel,
            out_shape=jax.ShapeDtypeStruct((M, C), x.dtype),
            grid_spec=pltpu.PrefetchScalarGridSpec(
                num_scalar_prefetch=0,
                grid=(n_m, n_h),
                in_specs=[
                    pl.BlockSpec((tm, C), lambda i, j: (i, 0)),   # x
                    pl.BlockSpec((C, th), lambda i, j: (0, j)),   # w1 slice
                    pl.BlockSpec((1, th), lambda i, j: (0, j)),   # b1 slice
                    pl.BlockSpec((th, C), lambda i, j: (j, 0)),   # w2 slice
                    pl.BlockSpec((1, C), lambda i, j: (0, 0)),    # b2
                ],
                out_specs=pl.BlockSpec((tm, C), lambda i, j: (i, 0)),
                scratch_shapes=[pltpu.VMEM((tm, C), jnp.float32)],
            ),
            compiler_params=pltpu.CompilerParams(
                dimension_semantics=("parallel", "arbitrary"),
                vmem_limit_bytes=vmem_limit,
            ),
            cost_estimate=cost,
        )(x2d, w1, b1, w2, b2)

    return out.reshape(B, T, C)


# ----------------------------- tests --------------------------------------- #

def _reference(x2d, w1, b1, w2, b2):
    h = x2d @ w1 + b1
    h = 0.5 * h * (1.0 + lax.erf(h * _INV_SQRT2))
    return h @ w2 + b2


def _make_params(key, C, H, dtype=jnp.float32):
    k1, k2, k3, k4 = jax.random.split(key, 4)
    w1 = jax.random.normal(k1, (C, H), dtype=dtype) * (1.0 / math.sqrt(C))
    b1 = jax.random.normal(k2, (1, H), dtype=dtype) * 0.01
    w2 = jax.random.normal(k3, (H, C), dtype=dtype) * (1.0 / math.sqrt(H))
    b2 = jax.random.normal(k4, (1, C), dtype=dtype) * 0.01
    return w1, b1, w2, b2


if __name__ == "__main__":
    key = jax.random.PRNGKey(0)

    # Test 1: small GPT-ish config (batch=2, seq=8, n_embd=32 -> hidden=128),
    # bias=True, dropout=0.0 (inference). Exercises the weights-resident path.
    B, T, C = 2, 8, 32
    H = 4 * C
    kx, kp = jax.random.split(key)
    x = jax.random.normal(kx, (B, T, C), dtype=jnp.float32)
    w1, b1, w2, b2 = _make_params(kp, C, H)

    y = jax.block_until_ready(mlp_forward(x, w1, b1, w2, b2))
    y_ref = _reference(x.reshape(B * T, C), w1, b1, w2, b2).reshape(B, T, C)
    assert jnp.allclose(y, y_ref, atol=2e-4, rtol=2e-4), "mismatch (small cfg)"

    # Test 2: resident path with multiple M tiles and a masked partial last
    # block (M = 288, tm = 128 -> last tile is 32 rows).
    B2, T2, C2 = 3, 96, 128
    H2 = 4 * C2
    kx2, kp2 = jax.random.split(jax.random.PRNGKey(1))
    x2 = jax.random.normal(kx2, (B2, T2, C2), dtype=jnp.float32)
    p2 = _make_params(kp2, C2, H2)

    y2 = jax.block_until_ready(mlp_forward(x2, *p2, tm=128))
    y2_ref = _reference(x2.reshape(B2 * T2, C2), *p2).reshape(B2, T2, C2)
    assert jnp.allclose(y2, y2_ref, atol=2e-4, rtol=2e-4), "mismatch (partial-block cfg)"

    # Test 3: force the streamed-weights fallback path (H reduction grid axis,
    # b2 folded into the accumulator init).
    B3, T3, C3 = 4, 128, 128
    H3 = 4 * C3
    kx3, kp3 = jax.random.split(jax.random.PRNGKey(2))
    x3 = jax.random.normal(kx3, (B3, T3, C3), dtype=jnp.float32)
    p3 = _make_params(kp3, C3, H3)

    y3 = jax.block_until_ready(
        mlp_forward(x3, *p3, tm=256, th=256, weights_resident=False))
    y3_ref = _reference(x3.reshape(B3 * T3, C3), *p3).reshape(B3, T3, C3)
    assert jnp.allclose(y3, y3_ref, atol=2e-4, rtol=2e-4), "mismatch (streamed cfg)"

    print("KERNEL_OK")
</pallas_src>

<mosaic_0001>
module attributes {stable_mosaic.version = 11 : i64} {
  func.func @_mlp_resident_kernel(%arg0: i32, %arg1: memref<16x32xf32, #tpu.memory_space<vmem>>, %arg2: memref<32x128xf32, #tpu.memory_space<vmem>>, %arg3: memref<1x128xf32, #tpu.memory_space<vmem>>, %arg4: memref<128x32xf32, #tpu.memory_space<vmem>>, %arg5: memref<1x32xf32, #tpu.memory_space<vmem>>, %arg6: memref<16x32xf32, #tpu.memory_space<vmem>>) attributes {dimension_semantics = [#tpu.dimension_semantics<parallel>], iteration_bounds = array<i64: 1>, scalar_prefetch = 0 : i64, scratch_operands = 0 : i64, tpu.core_type = #tpu.core_type<tc>, window_params = [{transform_indices = @transform_0, window_bounds = array<i64: 16, 32>}, {pipeline_mode = #tpu.pipeline_mode<synchronous>, transform_indices = @transform_1, window_bounds = array<i64: 32, 128>}, {pipeline_mode = #tpu.pipeline_mode<synchronous>, transform_indices = @transform_2, window_bounds = array<i64: 1, 128>}, {pipeline_mode = #tpu.pipeline_mode<synchronous>, transform_indices = @transform_3, window_bounds = array<i64: 128, 32>}, {pipeline_mode = #tpu.pipeline_mode<synchronous>, transform_indices = @transform_4, window_bounds = array<i64: 1, 32>}, {transform_indices = @transform_5, window_bounds = array<i64: 16, 32>}]} {
    %c0 = arith.constant 0 : index
    %c0_0 = arith.constant 0 : index
    %0 = vector.load %arg1[%c0, %c0_0] : memref<16x32xf32, #tpu.memory_space<vmem>>, vector<16x32xf32>
    %c0_1 = arith.constant 0 : index
    %c0_2 = arith.constant 0 : index
    %1 = vector.load %arg2[%c0_1, %c0_2] : memref<32x128xf32, #tpu.memory_space<vmem>>, vector<32x128xf32>
    %cst = arith.constant dense<0.000000e+00> : vector<16x128xf32>
    %2 = tpu.matmul %0, %1, %cst {dimension_numbers = #tpu.dot_dimension_numbers<[1], [0], [0], [1], [0, 0, 1, 1], [], []>} : vector<16x32xf32>, vector<32x128xf32>, vector<16x128xf32> -> vector<16x128xf32>
    %c0_3 = arith.constant 0 : index
    %c0_4 = arith.constant 0 : index
    %3 = vector.load %arg3[%c0_3, %c0_4] : memref<1x128xf32, #tpu.memory_space<vmem>>, vector<1x128xf32>
    %4 = vector.broadcast %3 : vector<1x128xf32> to vector<16x128xf32>
    %5 = arith.addf %2, %4 : vector<16x128xf32>
    %cst_5 = arith.constant 5.000000e-01 : f32
    %6 = vector.broadcast %cst_5 : f32 to vector<16x128xf32>
    %7 = arith.mulf %6, %5 : vector<16x128xf32>
    %cst_6 = arith.constant 0.707106769 : f32
    %8 = vector.broadcast %cst_6 : f32 to vector<16x128xf32>
    %9 = arith.mulf %5, %8 : vector<16x128xf32>
    %10 = math.erf %9 : vector<16x128xf32>
    %cst_7 = arith.constant 1.000000e+00 : f32
    %11 = vector.broadcast %cst_7 : f32 to vector<16x128xf32>
    %12 = arith.addf %11, %10 : vector<16x128xf32>
    %13 = arith.mulf %7, %12 : vector<16x128xf32>
    %c0_8 = arith.constant 0 : index
    %c0_9 = arith.constant 0 : index
    %14 = vector.load %arg4[%c0_8, %c0_9] : memref<128x32xf32, #tpu.memory_space<vmem>>, vector<128x32xf32>
    %cst_10 = arith.constant dense<0.000000e+00> : vector<16x32xf32>
    %15 = tpu.matmul %13, %14, %cst_10 {dimension_numbers = #tpu.dot_dimension_numbers<[1], [0], [0], [1], [0, 0, 1, 1], [], []>} : vector<16x128xf32>, vector<128x32xf32>, vector<16x32xf32> -> vector<16x32xf32>
    %c0_11 = arith.constant 0 : index
    %c0_12 = arith.constant 0 : index
    %16 = vector.load %arg5[%c0_11, %c0_12] : memref<1x32xf32, #tpu.memory_space<vmem>>, vector<1x32xf32>
    %17 = vector.broadcast %16 : vector<1x32xf32> to vector<16x32xf32>
    %18 = arith.addf %15, %17 : vector<16x32xf32>
    %c0_13 = arith.constant 0 : index
    %c0_14 = arith.constant 0 : index
    %19 = vector.load %arg6[%c0_13, %c0_14] : memref<16x32xf32, #tpu.memory_space<vmem>>, vector<16x32xf32>
    tpu.vector_store %arg6[%c0_13, %c0_14], %18 {strides = array<i32>} : memref<16x32xf32, #tpu.memory_space<vmem>>, vector<16x32xf32>,
    return
  }
  func.func @transform_0(%arg0: i32) -> (i32, i32) {
    %c0_i32 = arith.constant 0 : i32
    %c0_i32_0 = arith.constant 0 : i32
    return %arg0, %c0_i32 : i32, i32
  }
  func.func @transform_1(%arg0: i32) -> (i32, i32) {
    %c0_i32 = arith.constant 0 : i32
    %c0_i32_0 = arith.constant 0 : i32
    %c0_i32_1 = arith.constant 0 : i32
    return %c0_i32, %c0_i32_0 : i32, i32
  }
  func.func @transform_2(%arg0: i32) -> (i32, i32) {
    %c0_i32 = arith.constant 0 : i32
    %c0_i32_0 = arith.constant 0 : i32
    %c0_i32_1 = arith.constant 0 : i32
    return %c0_i32, %c0_i32_0 : i32, i32
  }
  func.func @transform_3(%arg0: i32) -> (i32, i32) {
    %c0_i32 = arith.constant 0 : i32
    %c0_i32_0 = arith.constant 0 : i32
    %c0_i32_1 = arith.constant 0 : i32
    return %c0_i32, %c0_i32_0 : i32, i32
  }
  func.func @transform_4(%arg0: i32) -> (i32, i32) {
    %c0_i32 = arith.constant 0 : i32
    %c0_i32_0 = arith.constant 0 : i32
    %c0_i32_1 = arith.constant 0 : i32
    return %c0_i32, %c0_i32_0 : i32, i32
  }
  func.func @transform_5(%arg0: i32) -> (i32, i32) {
    %c0_i32 = arith.constant 0 : i32
    %c0_i32_0 = arith.constant 0 : i32
    return %arg0, %c0_i32 : i32, i32
  }
}

</mosaic_0001>

<bundles_post_ra>
// kernel: tpu_custom_call.1
= control target key start
LH: loop header
LB: loop body
LE: loop exit
PB: predicated region body
PF: predicated region fallthrough
CT: control target
= control target key end

     0   :  { %vm34_vm0 = vcmask 261120   ;;  %s508_s0 = inlined_call_operand.vmem [shape: f32[16,32], index: 0, kind: input, shape index: {}]   ;;  %s509_s1 = inlined_call_operand.vmem [shape: f32[32,128], index: 1, kind: input, shape index: {}]   ;;  %s510_s2 = inlined_call_operand.vmem [shape: f32[1,128], index: 2, kind: input, shape index: {}]   ;;  %s511_s3 = inlined_call_operand.vmem [shape: f32[128,32], index: 3, kind: input, shape index: {}]   ;;  %s512_s4 = inlined_call_operand.vmem [shape: f32[1,32], index: 4, kind: input, shape index: {}]   ;;  %s513_s5 = inlined_call_operand.hbm [shape: f32[16,32], index: 5, kind: output, shape index: {}]  }
   0x1   :  { %v23_v0 = vld [vmem:[%s509_s1] sm:$0xff]  ;;  %v24_v1 = vld [vmem:[%s509_s1 + $0x8] sm:$0xff]  ;;  %v25_v2 = vld [vmem:[%s509_s1 + $0x10] sm:$0xff] }
   0x2   :  { %v316_v3 = vpack.c.bf16 %v24_v1, %v23_v0  ;;  %v26_v4 = vld [vmem:[%s509_s1 + $0x18] sm:$0xff]  ;;  %v21_v5 = vld [vmem:[%s508_s0] sm:$0xff]  ;;  %v127_v8 = vld [vmem:[%s511_s3 + $0x8] sm:$0xff] }
   0x3   :  { %v320_v6 = vpack.c.bf16 %v26_v4, %v25_v2  ;;  %278 = vmatprep.mubr.msk.f32.mxu0 %vm34_vm0, %v21_v5  ;;  %v126_v7 = vld [vmem:[%s511_s3] sm:$0xff]  ;;  %v128_v9 = vld [vmem:[%s511_s3 + $0x10] sm:$0xff]  ;;  %v129_v11 = vld [vmem:[%s511_s3 + $0x18] sm:$0xff] }
   0x4   :  { %317 = vmatprep.subr.bf16.mxu0 %v316_v3  ;;  %v324_v10 = vpack.c.bf16 %v127_v8, %v126_v7  ;;  %v328_v12 = vpack.c.bf16 %v129_v11, %v128_v9  ;;  %v130_v13 = vld [vmem:[%s511_s3 + $0x20] sm:$0xff]  ;;  %v131_v14 = vld [vmem:[%s511_s3 + $0x28] sm:$0xff] }
   0x5   :  { %319 = vmatpush3.bf16.msra.mxu0 %v316_v3 }
   0x6   :  { %10 = vsyncpa [#allocation3], 0  ;;  %321 = vmatprep.subr.bf16.mxu0 %v320_v6  ;;  %325 = vmatprep.subr.bf16.mxu1 %v324_v10  ;;  %v332_v15 = vpack.c.bf16 %v131_v14, %v130_v13  ;;  %v22_v16 = vld [vmem:[%s508_s0 + $0x8] sm:$0xff]  ;;  %v132_v17 = vld [vmem:[%s511_s3 + $0x30] sm:$0xff]  ;;  %s387_s11 = smov [#allocation2]  }
   0x7   :  { %327 = vmatpush3.bf16.msra.mxu1 %v324_v10  ;;  %v133_v18 = vld [vmem:[%s511_s3 + $0x38] sm:$0xff]  ;;  %v134_v20 = vld [vmem:[%s511_s3 + $0x40] sm:$0xff]  ;;  %v135_v21 = vld [vmem:[%s511_s3 + $0x48] sm:$0xff]  ;;  %s231_s12 = sshll.u32 %s387_s11, 4  ;;  %s232_s12 = int_to_ptr.vmem [resolvable:$true] %s231_s12 }
   0x8   :  { %329 = vmatprep.subr.bf16.mxu1 %v328_v12  ;;  %v336_v19 = vpack.c.bf16 %v133_v18, %v132_v17  ;;  %v340_v22 = vpack.c.bf16 %v135_v21, %v134_v20  ;;  %v136_v23 = vld [vmem:[%s511_s3 + $0x50] sm:$0xff]  ;;  %v137_v24 = vld [vmem:[%s511_s3 + $0x58] sm:$0xff]  ;;  %v138_v26 = vld [vmem:[%s511_s3 + $0x60] sm:$0xff]  ;;  %s363_s13 = scalar_lea.vmem %s232_s12, 256  ;;  %p368_p1 = scmp.lt.s32.totalorder %s232_s12, %s232_s12 }
   0x9   :  { %323 = vmatpush3.bf16.msra.mxu0 %v320_v6  ;;  %v344_v25 = vpack.c.bf16 %v137_v24, %v136_v23  ;;  %v139_v27 = vld [vmem:[%s511_s3 + $0x68] sm:$0xff]  ;;  %v140_v29 = vld [vmem:[%s511_s3 + $0x70] sm:$0xff]  ;;  %v141_v30 = vld [vmem:[%s511_s3 + $0x78] sm:$0xff]  ;;  %p364_p0 = scmp.ne.s32.totalorder %s232_s12, %s363_s13  ;;  %p369_p2 = scmp.lt.s32.totalorder %s363_s13, %s363_s13 }
   0xa   :  { %v348_v28 = vpack.c.bf16 %v139_v27, %v138_v26  ;;  %v352_v31 = vpack.c.bf16 %v141_v30, %v140_v29  ;;  %v242_v32 = vld [vmem:[%s510_s2] ss:$0 sm:$0xff] }
   0xb   :  { %331 = vmatpush3.bf16.msra.mxu1 %v328_v12  ;;  %v245_v47 = vld [vmem:[%s512_s4] ss:$0 sm:$0xff]  ;;  %p370_p3 = por %p369_p2, %p368_p1 }
   0xc   :  { %279 = vmatmul.mubr.msk.f32.vlgmr.msra.gmra.mrb[0].mxu0 %vm34_vm0, %v22_v16  ;;  %333 = vmatprep.subr.bf16.mxu1 %v332_v15 }
   0xd   :  { %p371_p4 = pnand %p370_p3, %p364_p0 }
   0xf   :  { %335 = vmatpush3.bf16.msra.mxu1 %v332_v15 }
  0x10   :  { %337 = vmatprep.subr.bf16.mxu1 %v336_v19 }
  0x13   :  { %339 = vmatpush3.bf16.msra.mxu1 %v336_v19 }
  0x14   :  { %341 = vmatprep.subr.bf16.mxu1 %v340_v22 }
  0x17   :  { %343 = vmatpush3.bf16.msra.mxu1 %v340_v22 }
  0x18   :  { %345 = vmatprep.subr.bf16.mxu1 %v344_v25 }
  0x1b   :  { %347 = vmatpush3.bf16.msra.mxu1 %v344_v25 }
  0x1c   :  { %349 = vmatprep.subr.bf16.mxu1 %v348_v28 }
  0x1f   :  { %351 = vmatpush3.bf16.msra.mxu1 %v348_v28 }
  0x20   :  { %353 = vmatprep.subr.bf16.mxu1 %v352_v31 }
  0x23   :  { %355 = vmatpush3.bf16.msra.mxu1 %v352_v31 }
  0xdf   :  { %v280_v33 = vpop.f32.mrb[0].mxu0 }
  0xe0   :  { %v113_v34 = vadd.f32 %v280_v33, %v242_v32  ;;  %v107_v35 = vpop.f32.mrb[1].mxu0 }
  0xe1   :  { %v108_v36 = vadd.f32 %v242_v32, %v107_v35 }
  0xe2   :  { %v119_v37 = vmul.f32 0.70710677, %v113_v34  ;;  %v117_v44 = vmul.f32 0.5, %v113_v34 }
  0xe3   :  { %v118_v38 = vmul.f32 0.70710677, %v108_v36  ;;  %v116_v42 = vmul.f32 0.5, %v108_v36 }
  0xe4   :  { %359 = verf.f32 %v119_v37 }
  0xe5   :  { %361 = verf.f32 %v118_v38 }
  0xee   :  { %v360_v39 = vpop.eup %359 }
  0xef   :  { %v362_v40 = vpop.eup %361  ;;  %v123_v41 = vadd.f32 1.0, %v360_v39 }
  0xf0   :  { %v122_v43 = vadd.f32 1.0, %v362_v40 }
  0xf1   :  { %v125_v46 = vmul.f32 %v123_v41, %v117_v44 }
  0xf2   :  { %v124_v45 = vmul.f32 %v122_v43, %v116_v42 }
  0xf4   :  { %313 = vmatprep.mubr.f32.mxu1 %v124_v45 }
  0xf5   :  { %314 = vmatmul.mubr.f32.vlgmr.msra.gmra.mrb[0].mxu1 %v125_v46 }
 0x1c8   :  { %v315_v48 = vpop.f32.mrb[0].mxu1 }
 0x1c9   :  { %v221_v49 = vadd.f32 %v315_v48, %v245_v47  ;;  %v215_v50 = vpop.f32.mrb[1].mxu1 }
 0x1ca   :  { %v216_v51 = vadd.f32 %v245_v47, %v215_v50 }
 0x1cb   :  { %225 = vst.msk [vmem:[#allocation2 + $0x8] sm:$0xff] %vm34_vm0, %v221_v49 }
 0x1cc   :  { %224 = vst.msk [vmem:[#allocation2] sm:$0xff] %vm34_vm0, %v216_v51 }
 0x1cd   :  { %374 = shalt.err (!%p371_p4)
}
 0x1ce   :  { %s375_s15 = scalar_lea.hbm %s513_s5, 256 }
 0x1cf   :  { %p376_p5 = scmp.ne.s32.totalorder %s513_s5, %s375_s15  ;;  %p379_p6 = scmp.lt.u32.totalorder %s375_s15, %s513_s5 }
 0x1d1   :  { %p381_p7 = pnand %p379_p6, %p376_p5 }
 0x1d3   :  { %384 = shalt.err (!%p381_p7)
}
 0x1d4   :  { %s388_s20 = smov 128   ;;  %s389_s21 = smov 8  }
 0x1d5   :  { %237 = dma.vmem_to_hbm [thread:$0]  %s232_s12, 256, %s513_s5, [#allocation3], %s388_s20, %s388_s20, %s389_s21  }
 0x1d6   :  { %385 = dma.done.wait [#allocation3], 256  }
 0x1d7   :  { %386 = vsyncadd [#allocation3], 4294967040 }
 0x1d8   :  { %241 = vsyncpa [#allocation3], 1 }

</bundles_post_ra>
